<compile_context>
chip_gen: v6e
topology: v6e:2x2x1
jax: 0.10.0
libtpu: 0.0.40
codegen_flags: <defaults>
</compile_context>

<pallas_src>
import functools

import jax
import jax.numpy as jnp
from jax import lax
from jax.experimental import pallas as pl
from jax.experimental.pallas import tpu as pltpu


EXPANSION = 4
BN_EPS = 1e-5
VMEM_LIMIT = 32 * 1024 * 1024   # explicit scoped-VMEM budget (safe on v5e/v6e/v7x)


def _round_up(x, m):
    return (x + m - 1) // m * m


# ----------------------------------------------------------------------------
# Single-pass fused GEMM:  out = [relu]( X @ W + bias [+ residual] )
#   - bf16 operands, f32 accumulation on the MXU, no K tiling (weight resident)
#   - grid (Cout tiles, M tiles); M innermost so the weight block never changes
# ----------------------------------------------------------------------------
def _gemm_kernel(x_ref, w_ref, b_ref, o_ref, *, relu):
    acc = jnp.dot(x_ref[...], w_ref[...], preferred_element_type=jnp.float32)
    acc = acc + b_ref[...]
    if relu:
        acc = jnp.maximum(acc, 0.0)
    o_ref[...] = acc.astype(o_ref.dtype)


def _gemm_res_kernel(x_ref, w_ref, b_ref, r_ref, o_ref, *, relu):
    acc = jnp.dot(x_ref[...], w_ref[...], preferred_element_type=jnp.float32)
    acc = acc + b_ref[...] + r_ref[...]          # residual kept in f32
    if relu:
        acc = jnp.maximum(acc, 0.0)
    o_ref[...] = acc.astype(o_ref.dtype)


def _pick_tn(cout):
    # Keep full Cout resident unless it is very wide (VMEM budget on v7x).
    if cout <= 1024 or cout % 1024 != 0:
        return cout
    return 1024


def fused_matmul_bias(x2d, w2d, bias, *, relu=True, residual=None,
                      tm=512, out_dtype=jnp.bfloat16):
    """x2d: (M, K), w2d: (K, Cout) (BN scale already folded), bias: (Cout,)."""
    M, K = x2d.shape
    Kw, Cout = w2d.shape
    assert K == Kw

    tm = min(tm, _round_up(M, 8))
    Mp = _round_up(M, tm)
    tn = _pick_tn(Cout)
    nm, nn = Mp // tm, Cout // tn

    x = x2d.astype(jnp.bfloat16)
    if Mp != M:
        x = jnp.pad(x, ((0, Mp - M), (0, 0)))
    w = w2d.astype(jnp.bfloat16)
    b = bias.reshape(1, Cout).astype(jnp.float32)

    in_specs = [
        pl.BlockSpec((tm, K), lambda j, i: (i, 0)),    # activation streams
        pl.BlockSpec((K, tn), lambda j, i: (0, j)),    # weight: resident per j
        pl.BlockSpec((1, tn), lambda j, i: (0, j)),
    ]
    args = [x, w, b]
    if residual is not None:
        r = residual.astype(jnp.float32)               # f32 residual add
        if Mp != M:
            r = jnp.pad(r, ((0, Mp - M), (0, 0)))
        in_specs.append(pl.BlockSpec((tm, tn), lambda j, i: (i, j)))
        args.append(r)
        kernel = functools.partial(_gemm_res_kernel, relu=relu)
    else:
        kernel = functools.partial(_gemm_kernel, relu=relu)

    cost = pl.CostEstimate(
        flops=2 * Mp * K * Cout, transcendentals=0,
        bytes_accessed=int(2 * (nn * Mp * K + K * Cout)
                           + Mp * Cout * jnp.dtype(out_dtype).itemsize))

    out = pl.pallas_call(
        kernel,
        out_shape=jax.ShapeDtypeStruct((Mp, Cout), out_dtype),
        grid=(nn, nm),                                  # M innermost (fastest)
        in_specs=in_specs,
        out_specs=pl.BlockSpec((tm, tn), lambda j, i: (i, j)),
        compiler_params=pltpu.CompilerParams(
            dimension_semantics=("parallel", "parallel"),
            vmem_limit_bytes=VMEM_LIMIT),
        cost_estimate=cost,
    )(*args)
    return out[:M] if Mp != M else out


# ----------------------------------------------------------------------------
# conv3(1x1) + bn3 + downsample(1x1 stride conv + bn) + add + relu — one kernel
# ----------------------------------------------------------------------------
def _dual_gemm_kernel(x_ref, w_ref, xd_ref, wd_ref, b_ref, o_ref):
    acc = jnp.dot(x_ref[...], w_ref[...], preferred_element_type=jnp.float32)
    acc = acc + jnp.dot(xd_ref[...], wd_ref[...],
                        preferred_element_type=jnp.float32)
    o_ref[...] = jnp.maximum(acc + b_ref[...], 0.0).astype(o_ref.dtype)


def fused_dual_matmul_bias(x2d, w2d, xd2d, wd2d, bias, *, tm=512,
                           out_dtype=jnp.bfloat16):
    M, K1 = x2d.shape
    Md, K2 = xd2d.shape
    assert M == Md
    Cout = w2d.shape[1]

    tm = min(tm, _round_up(M, 8))
    Mp = _round_up(M, tm)
    tn = _pick_tn(Cout)
    nm, nn = Mp // tm, Cout // tn

    x = x2d.astype(jnp.bfloat16)
    xd = xd2d.astype(jnp.bfloat16)
    if Mp != M:
        x = jnp.pad(x, ((0, Mp - M), (0, 0)))
        xd = jnp.pad(xd, ((0, Mp - M), (0, 0)))
    w = w2d.astype(jnp.bfloat16)
    wd = wd2d.astype(jnp.bfloat16)
    b = bias.reshape(1, Cout).astype(jnp.float32)

    cost = pl.CostEstimate(
        flops=2 * Mp * (K1 + K2) * Cout, transcendentals=0,
        bytes_accessed=int(2 * (nn * Mp * (K1 + K2) + (K1 + K2) * Cout)
                           + Mp * Cout * jnp.dtype(out_dtype).itemsize))

    out = pl.pallas_call(
        _dual_gemm_kernel,
        out_shape=jax.ShapeDtypeStruct((Mp, Cout), out_dtype),
        grid=(nn, nm),
        in_specs=[
            pl.BlockSpec((tm, K1), lambda j, i: (i, 0)),
            pl.BlockSpec((K1, tn), lambda j, i: (0, j)),
            pl.BlockSpec((tm, K2), lambda j, i: (i, 0)),
            pl.BlockSpec((K2, tn), lambda j, i: (0, j)),
            pl.BlockSpec((1, tn), lambda j, i: (0, j)),
        ],
        out_specs=pl.BlockSpec((tm, tn), lambda j, i: (i, j)),
        compiler_params=pltpu.CompilerParams(
            dimension_semantics=("parallel", "parallel"),
            vmem_limit_bytes=VMEM_LIMIT),
        cost_estimate=cost,
    )(x, w, xd, wd, b)
    return out[:M] if Mp != M else out


# ----------------------------------------------------------------------------
# conv2: 3x3 / stride s / pad 1 + bn2 + relu, as 9 accumulating GEMMs per
# output-row tile.  The padded activation is decomposed into s*s "phase"
# planes so each tap reads a *contiguous* row window (flat offset) of one
# phase plane.  The phase planes stay resident in VMEM across the M-tile axis;
# each M tile accumulates the 9 taps into a VMEM f32 scratch.
# ----------------------------------------------------------------------------
def _conv2_tap_kernel(x_ref, w_ref, b_ref, o_ref, acc_ref, *,
                      taps, pw, stride, tm_rows):
    # x_ref: (s*s [phases], PH*PW, C)   w_ref: (9, C, Cout)   b_ref: (1, Cout)
    base = pl.multiple_of(pl.program_id(1) * tm_rows, 8)
    acc_ref[...] = jnp.zeros_like(acc_ref)
    for t, (ky, kx) in enumerate(taps):
        p = (ky % stride) * stride + (kx % stride)       # static phase index
        off = (ky // stride) * pw + (kx // stride)       # static row offset
        xs = x_ref[p, pl.ds(base + off, tm_rows), :]
        acc_ref[...] += jnp.dot(xs, w_ref[t],
                                preferred_element_type=jnp.float32)
    o_ref[...] = jnp.maximum(acc_ref[...] + b_ref[...], 0.0).astype(o_ref.dtype)


def conv2_3x3_bn_relu(x_nhwc, w_oihw, scale, bias, stride, *, max_tm=512):
    """x_nhwc: (N,H,W,C); w_oihw: (Cout,C,3,3); BN scale folded into weights."""
    N, H, W, C = x_nhwc.shape
    Cout = w_oihw.shape[0]
    S = stride
    Ho = (H + 2 - 3) // S + 1
    Wo = (W + 2 - 3) // S + 1
    PW = Wo + 2                               # phase width (covers tap cols)
    m_rows = Ho * PW                          # output anchors per image

    tm_rows = max_tm if m_rows > max_tm else _round_up(m_rows, 8)
    Mp = _round_up(m_rows, tm_rows)
    nm = Mp // tm_rows
    max_off = (2 // S) * PW + (2 // S)        # largest static tap offset
    phase_rows = -(-(max(H, W) + 2) // S)     # rows any phase actually has
    PH = max(-(-(Mp + max_off) // PW), phase_rows)

    xpad = jnp.pad(x_nhwc.astype(jnp.bfloat16),
                   ((0, 0), (1, 1), (1, 1), (0, 0)))
    phases = []
    for py in range(S):
        for px in range(S):
            ph = xpad[:, py::S, px::S, :]
            ph = jnp.pad(ph, ((0, 0), (0, PH - ph.shape[1]),
                              (0, PW - ph.shape[2]), (0, 0)))
            phases.append(ph)
    xph = jnp.stack(phases, axis=1).reshape(N, S * S, PH * PW, C)

    taps = tuple((ky, kx) for ky in range(3) for kx in range(3))
    w9 = jnp.stack(
        [w_oihw[:, :, ky, kx].T * scale[None, :] for ky, kx in taps],
        axis=0).astype(jnp.bfloat16)                      # (9, C, Cout)
    b2 = bias.reshape(1, Cout).astype(jnp.float32)

    kernel = functools.partial(_conv2_tap_kernel, taps=taps, pw=PW,
                               stride=S, tm_rows=tm_rows)
    cost = pl.CostEstimate(
        flops=2 * 9 * N * Mp * C * Cout, transcendentals=0,
        bytes_accessed=int(2 * (N * S * S * PH * PW * C + 9 * C * Cout
                                + N * Mp * Cout)))

    out = pl.pallas_call(
        kernel,
        out_shape=jax.ShapeDtypeStruct((N, Mp, Cout), jnp.bfloat16),
        grid=(N, nm),                                     # M-tile axis innermost
        in_specs=[
            # phase planes: block index constant across m -> VMEM-resident
            pl.BlockSpec((None, S * S, PH * PW, C), lambda n, m: (n, 0, 0, 0)),
            pl.BlockSpec((9, C, Cout), lambda n, m: (0, 0, 0)),
            pl.BlockSpec((1, Cout), lambda n, m: (0, 0)),
        ],
        out_specs=pl.BlockSpec((None, tm_rows, Cout), lambda n, m: (n, m, 0)),
        scratch_shapes=[pltpu.VMEM((tm_rows, Cout), jnp.float32)],
        compiler_params=pltpu.CompilerParams(
            dimension_semantics=("parallel", "parallel"),
            vmem_limit_bytes=VMEM_LIMIT),
        cost_estimate=cost,
    )(xph, w9, b2)

    out = out[:, :m_rows, :] if Mp != m_rows else out
    out = out.reshape(N, Ho, PW, Cout)[:, :, :Wo, :]      # drop pad columns
    return out


# ----------------------------------------------------------------------------
# Parameter construction (deterministic, synthetic)
# ----------------------------------------------------------------------------
def _bn_params(key, c):
    k1, k2, k3, k4 = jax.random.split(key, 4)
    gamma = jax.random.uniform(k1, (c,), jnp.float32, 0.5, 1.5)
    beta = 0.1 * jax.random.normal(k2, (c,), jnp.float32)
    mean = 0.1 * jax.random.normal(k3, (c,), jnp.float32)
    var = jax.random.uniform(k4, (c,), jnp.float32, 0.5, 1.5)
    return gamma, beta, mean, var


def _kaiming(key, shape):
    out_c, _, kh, kw = shape
    std = (2.0 / (kh * kw * out_c)) ** 0.5
    return std * jax.random.normal(key, shape, jnp.float32)


def init_bottleneck_params(key, in_channel, out_channel, stride,
                           groups=1, width_per_group=64):
    width = int(out_channel * (width_per_group / 64.0)) * groups
    cout = out_channel * EXPANSION
    keys = jax.random.split(key, 8)
    p = {}
    p["conv1_w"] = _kaiming(keys[0], (width, in_channel, 1, 1))
    p["bn1"] = _bn_params(keys[1], width)
    p["conv2_w"] = _kaiming(keys[2], (width, width, 3, 3))
    p["bn2"] = _bn_params(keys[3], width)
    p["conv3_w"] = _kaiming(keys[4], (cout, width, 1, 1))
    p["bn3"] = _bn_params(keys[5], cout)
    if stride != 1 or in_channel != cout:
        p["ds_w"] = _kaiming(keys[6], (cout, in_channel, 1, 1))
        p["ds_bn"] = _bn_params(keys[7], cout)
    return p


def _fold_bn(bn):
    g, b, m, v = bn
    s = g / jnp.sqrt(v + BN_EPS)
    return s, b - m * s


# ----------------------------------------------------------------------------
# Bottleneck forward using the Pallas kernels (NHWC internally)
# ----------------------------------------------------------------------------
def bottleneck_forward_nhwc(x, p, stride):
    N, H, W, Cin = x.shape
    width = p["conv1_w"].shape[0]
    cout = p["conv3_w"].shape[0]
    x_bf = x.astype(jnp.bfloat16)

    # conv1 (1x1) + bn1 + relu  (BN scale folded into weight columns)
    s1, b1 = _fold_bn(p["bn1"])
    w1 = p["conv1_w"][:, :, 0, 0].T * s1[None, :]
    out1 = fused_matmul_bias(x_bf.reshape(N * H * W, Cin), w1, b1,
                             relu=True, out_dtype=jnp.bfloat16)
    out1 = out1.reshape(N, H, W, width)

    # conv2 (3x3, stride, pad=1) + bn2 + relu  (9-tap fused kernel, no im2col)
    s2, b2 = _fold_bn(p["bn2"])
    out2 = conv2_3x3_bn_relu(out1, p["conv2_w"], s2, b2, stride)
    _, Ho, Wo, _ = out2.shape

    # conv3 (1x1) + bn3 + residual + relu
    s3, b3 = _fold_bn(p["bn3"])
    w3 = p["conv3_w"][:, :, 0, 0].T * s3[None, :]
    x2 = out2.reshape(N * Ho * Wo, width)

    if "ds_w" in p:
        # downsample path fused into the same kernel (dual GEMM, no HBM trip)
        sd, bd = _fold_bn(p["ds_bn"])
        wd = p["ds_w"][:, :, 0, 0].T * sd[None, :]
        xd = x_bf[:, ::stride, ::stride, :].reshape(N * Ho * Wo, Cin)
        out3 = fused_dual_matmul_bias(x2, w3, xd, wd, b3 + bd,
                                      out_dtype=jnp.bfloat16)
    else:
        identity = x.reshape(N * Ho * Wo, Cin)   # f32 residual, Cin == cout
        out3 = fused_matmul_bias(x2, w3, b3, relu=True, residual=identity,
                                 out_dtype=jnp.bfloat16)
    return out3.reshape(N, Ho, Wo, cout)


# ----------------------------------------------------------------------------
# Pure-JAX NCHW f32 reference (mirrors the PyTorch forward) for verification
# ----------------------------------------------------------------------------
def _conv(x, w, stride, padding):
    return lax.conv_general_dilated(
        x, w, (stride, stride), ((padding, padding), (padding, padding)),
        dimension_numbers=("NCHW", "OIHW", "NCHW"))


def _bn(x, bn):
    g, b, m, v = bn
    s = g / jnp.sqrt(v + BN_EPS)
    return x * s[None, :, None, None] + (b - m * s)[None, :, None, None]


def bottleneck_reference_nchw(x, p, stride):
    identity = x
    if "ds_w" in p:
        identity = _bn(_conv(x, p["ds_w"], stride, 0), p["ds_bn"])
    out = jax.nn.relu(_bn(_conv(x, p["conv1_w"], 1, 0), p["bn1"]))
    out = jax.nn.relu(_bn(_conv(out, p["conv2_w"], stride, 1), p["bn2"]))
    out = _bn(_conv(out, p["conv3_w"], 1, 0), p["bn3"])
    out = out + identity
    return jax.nn.relu(out)


# ----------------------------------------------------------------------------
if __name__ == "__main__":
    key = jax.random.PRNGKey(0)

    # Bottleneck-consistent configs: (N, in_channel, H, W, out_channel, stride)
    configs = [
        (2, 16, 8, 8, 8, 2),     # downsample branch (stride 2, channel change)
        (2, 32, 8, 8, 8, 1),     # plain identity branch (in_channel == out*4)
        (2, 256, 8, 8, 64, 1),   # wider channels (exercises 128/256-lane tiles)
    ]

    for idx, (N, cin, H, W, cmid, stride) in enumerate(configs):
        kx, kp = jax.random.split(jax.random.fold_in(key, idx))
        x_nchw = jax.random.normal(kx, (N, cin, H, W), jnp.float32)
        params = init_bottleneck_params(kp, cin, cmid, stride)

        # Pallas path (NHWC internally, returned as NCHW to match PyTorch).
        x_nhwc = jnp.transpose(x_nchw, (0, 2, 3, 1))
        out_nhwc = bottleneck_forward_nhwc(x_nhwc, params, stride)
        out_nchw = jnp.transpose(out_nhwc, (0, 3, 1, 2))
        jax.block_until_ready(out_nchw)

        # Verify against the pure-JAX f32 reference (kernel computes in bf16,
        # hence the loose tolerance).
        ref = bottleneck_reference_nchw(x_nchw, params, stride)
        assert out_nchw.shape == ref.shape, (out_nchw.shape, ref.shape)
        if not bool(jnp.allclose(out_nchw.astype(jnp.float32), ref,
                                 atol=2e-1, rtol=1e-1)):
            max_err = float(jnp.max(jnp.abs(out_nchw.astype(jnp.float32) - ref)))
            raise AssertionError(
                f"Pallas output mismatch (config {idx}), max abs err = {max_err}")

    print("KERNEL_OK")
</pallas_src>

<mosaic_0001>
module attributes {stable_mosaic.version = 11 : i64} {
  func.func @_gemm_kernel(%arg0: i32, %arg1: i32, %arg2: memref<128x16xbf16, #tpu.memory_space<vmem>>, %arg3: memref<16x8xbf16, #tpu.memory_space<vmem>>, %arg4: memref<1x8xf32, #tpu.memory_space<vmem>>, %arg5: memref<128x8xbf16, #tpu.memory_space<vmem>>) attributes {dimension_semantics = [#tpu.dimension_semantics<parallel>, #tpu.dimension_semantics<parallel>], iteration_bounds = array<i64: 1, 1>, scalar_prefetch = 0 : i64, scratch_operands = 0 : i64, tpu.core_type = #tpu.core_type<tc>, window_params = [{transform_indices = @transform_0, window_bounds = array<i64: 128, 16>}, {transform_indices = @transform_1, window_bounds = array<i64: 16, 8>}, {transform_indices = @transform_2, window_bounds = array<i64: 1, 8>}, {transform_indices = @transform_3, window_bounds = array<i64: 128, 8>}]} {
    %c0 = arith.constant 0 : index
    %c0_0 = arith.constant 0 : index
    %0 = vector.load %arg2[%c0, %c0_0] : memref<128x16xbf16, #tpu.memory_space<vmem>>, vector<128x16xbf16>
    %c0_1 = arith.constant 0 : index
    %c0_2 = arith.constant 0 : index
    %1 = vector.load %arg3[%c0_1, %c0_2] : memref<16x8xbf16, #tpu.memory_space<vmem>>, vector<16x8xbf16>
    %cst = arith.constant dense<0.000000e+00> : vector<128x8xf32>
    %2 = tpu.matmul %0, %1, %cst {dimension_numbers = #tpu.dot_dimension_numbers<[1], [0], [0], [1], [0, 0, 1, 1], [], []>} : vector<128x16xbf16>, vector<16x8xbf16>, vector<128x8xf32> -> vector<128x8xf32>
    %c0_3 = arith.constant 0 : index
    %c0_4 = arith.constant 0 : index
    %3 = vector.load %arg4[%c0_3, %c0_4] : memref<1x8xf32, #tpu.memory_space<vmem>>, vector<1x8xf32>
    %4 = vector.broadcast %3 : vector<1x8xf32> to vector<128x8xf32>
    %5 = arith.addf %2, %4 : vector<128x8xf32>
    %cst_5 = arith.constant 0.000000e+00 : f32
    %6 = vector.broadcast %cst_5 : f32 to vector<128x8xf32>
    %7 = arith.maximumf %5, %6 : vector<128x8xf32>
    %8 = arith.truncf %7 : vector<128x8xf32> to vector<128x8xbf16>
    %c0_6 = arith.constant 0 : index
    %c0_7 = arith.constant 0 : index
    %9 = vector.load %arg5[%c0_6, %c0_7] : memref<128x8xbf16, #tpu.memory_space<vmem>>, vector<128x8xbf16>
    tpu.vector_store %arg5[%c0_6, %c0_7], %8 {strides = array<i32>} : memref<128x8xbf16, #tpu.memory_space<vmem>>, vector<128x8xbf16>,
    return
  }
  func.func @transform_0(%arg0: i32, %arg1: i32) -> (i32, i32) {
    %c0_i32 = arith.constant 0 : i32
    %c0_i32_0 = arith.constant 0 : i32
    return %arg1, %c0_i32 : i32, i32
  }
  func.func @transform_1(%arg0: i32, %arg1: i32) -> (i32, i32) {
    %c0_i32 = arith.constant 0 : i32
    %c0_i32_0 = arith.constant 0 : i32
    return %c0_i32, %arg0 : i32, i32
  }
  func.func @transform_2(%arg0: i32, %arg1: i32) -> (i32, i32) {
    %c0_i32 = arith.constant 0 : i32
    %c0_i32_0 = arith.constant 0 : i32
    return %c0_i32, %arg0 : i32, i32
  }
  func.func @transform_3(%arg0: i32, %arg1: i32) -> (i32, i32) {
    %c0_i32 = arith.constant 0 : i32
    return %arg1, %arg0 : i32, i32
  }
}

</mosaic_0001>

<bundles_post_ra>
// kernel: tpu_custom_call.1
= control target key start
LH: loop header
LB: loop body
LE: loop exit
PB: predicated region body
PF: predicated region fallthrough
CT: control target
= control target key end

     0   :  { %vm86_vm0 = vcmask 130048   ;;  %vm288_vm1 = vcmask 60416   ;;  %s537_s1 = inlined_call_operand.vmem [shape: bf16[16,8], index: 1, kind: input, shape index: {}]   ;;  %s538_s0 = inlined_call_operand.vmem [shape: bf16[128,16], index: 0, kind: input, shape index: {}]   ;;  %s539_s2 = inlined_call_operand.vmem [shape: f32[1,8], index: 2, kind: input, shape index: {}]   ;;  %s540_s3 = inlined_call_operand.vmem [shape: bf16[128,8], index: 3, kind: output, shape index: {}]  }
   0x1   :  { %v388_v0 = vld [vmem:[%s537_s1] sm:$0xff]   ;;  %v391_v3 = vld [vmem:[%s538_s0 + $0x8] sm:$0xff]   ;;  %v393_v5 = vld [vmem:[%s538_s0 + $0x10] sm:$0xff]  }
   0x2   :  { %v389_v1 = vld [vmem:[%s538_s0] sm:$0xff]   ;;  %368 = vmatprep.subr.bf16.mxu0 %v388_v0  ;;  %386 = vmatprep.subr.bf16.mxu1 %v388_v0  ;;  %v392_v4 = vld [vmem:[%s538_s0 + $0x28] sm:$0xff]   ;;  %v394_v6 = vld [vmem:[%s538_s0 + $0x30] sm:$0xff]  }
   0x3   :  { %v390_v2 = vld [vmem:[%s538_s0 + $0x20] sm:$0xff]   ;;  %369 = vmatpush3.bf16.msra.mxu0 %v388_v0  ;;  %387 = vmatpush3.bf16.msra.mxu1 %v388_v0  ;;  %v395_v7 = vld [vmem:[%s538_s0 + $0x18] sm:$0xff]  }
   0x4   :  { %370 = vmatprep.mubr.msk.bf16.mxu0 %vm86_vm0, %v389_v1  ;;  %378 = vmatprep.mubr.msk.bf16.mxu1 %vm86_vm0, %v390_v2  ;;  %v396_v8 = vld [vmem:[%s538_s0 + $0x38] sm:$0xff]   ;;  %v455_v9 = vld [vmem:[%s539_s2] ss:$0 sm:$0xff] }
   0x6   :  { %371 = vmatmul.mubr.msk.bf16.vlgmr.msra.gmra.mxu0 %vm86_vm0, %v391_v3  ;;  %379 = vmatmul.mubr.msk.bf16.vlgmr.msra.gmra.mxu1 %vm86_vm0, %v392_v4 }
   0x7   :  { %374 = vmatprep.mubr.msk.bf16.mxu0 %vm86_vm0, %v393_v5  ;;  %382 = vmatprep.mubr.msk.bf16.mxu1 %vm86_vm0, %v394_v6 }
   0xe   :  { %375 = vmatmul.mubr.msk.bf16.gmra.mxu0 %vm86_vm0, %v395_v7  ;;  %383 = vmatmul.mubr.msk.bf16.gmra.mxu1 %vm86_vm0, %v396_v8 }
  0xc6   :  { %v372_v10 = vpop.f32.mrf.mxu0  ;;  %v380_v11 = vpop.f32.mrf.mxu1 }
  0xc7   :  { %v154_v12 = vadd.f32 %v372_v10, %v455_v9  ;;  %v186_v13 = vadd.f32 %v380_v11, %v455_v9 }
  0xc8   :  { %v145_v14 = vpop.f32.mrf.mxu0  ;;  %v177_v15 = vpop.f32.mrf.mxu1 }
  0xc9   :  { %v210_v16 = vmax.f32 %v154_v12, 0.0  ;;  %v218_v17 = vmax.f32 %v186_v13, 0.0  ;;  %v146_v18 = vadd.f32 %v455_v9, %v145_v14  ;;  %v178_v19 = vadd.f32 %v455_v9, %v177_v15 }
  0xca   :  { %v373_v20 = vpop.f32.mrf.mxu0  ;;  %v381_v21 = vpop.f32.mrf.mxu1 }
  0xcb   :  { %v345_v22 = vpack.c.bf16 %v210_v16, %v210_v16  ;;  %v353_v23 = vpack.c.bf16 %v218_v17, %v218_v17  ;;  %v208_v24 = vmax.f32 %v146_v18, 0.0  ;;  %v216_v25 = vmax.f32 %v178_v19, 0.0 }
  0xcc   :  { %v157_v26 = vadd.f32 %v373_v20, %v455_v9  ;;  %v189_v27 = vadd.f32 %v381_v21, %v455_v9  ;;  %v148_v28 = vpop.f32.mrf.mxu0  ;;  %v180_v29 = vpop.f32.mrf.mxu1 }
  0xcd   :  { %291 = vst.msk [vmem:[%s540_s3 + $0x8] sm:$0xf] %vm288_vm1, %v345_v22  ;;  %299 = vst.msk [vmem:[%s540_s3 + $0x28] sm:$0xf] %vm288_vm1, %v353_v23  ;;  %v343_v30 = vpack.c.bf16 %v208_v24, %v208_v24  ;;  %v351_v31 = vpack.c.bf16 %v216_v25, %v216_v25  ;;  %v149_v32 = vadd.f32 %v455_v9, %v148_v28 }
  0xce   :  { %v181_v33 = vadd.f32 %v455_v9, %v180_v29  ;;  %v211_v34 = vmax.f32 %v157_v26, 0.0  ;;  %v219_v35 = vmax.f32 %v189_v27, 0.0  ;;  %v376_v36 = vpop.f32.mrf.mxu0  ;;  %v384_v37 = vpop.f32.mrf.mxu1 }
  0xcf   :  { %289 = vst.msk [vmem:[%s540_s3] sm:$0xf] %vm288_vm1, %v343_v30  ;;  %297 = vst.msk [vmem:[%s540_s3 + $0x20] sm:$0xf] %vm288_vm1, %v351_v31  ;;  %v209_v38 = vmax.f32 %v149_v32, 0.0  ;;  %v170_v40 = vadd.f32 %v376_v36, %v455_v9  ;;  %v202_v41 = vadd.f32 %v384_v37, %v455_v9 }
  0xd0   :  { %v217_v39 = vmax.f32 %v181_v33, 0.0  ;;  %v346_v42 = vpack.c.bf16 %v211_v34, %v211_v34  ;;  %v354_v43 = vpack.c.bf16 %v219_v35, %v219_v35  ;;  %v161_v44 = vpop.f32.mrf.mxu0  ;;  %v193_v45 = vpop.f32.mrf.mxu1 }
  0xd1   :  { %v344_v46 = vpack.c.bf16 %v209_v38, %v209_v38  ;;  %v214_v48 = vmax.f32 %v170_v40, 0.0  ;;  %v222_v49 = vmax.f32 %v202_v41, 0.0  ;;  %v162_v50 = vadd.f32 %v455_v9, %v161_v44 }
  0xd2   :  { %v352_v47 = vpack.c.bf16 %v217_v39, %v217_v39  ;;  %292 = vst.msk [vmem:[%s540_s3 + $0xc] sm:$0xf] %vm288_vm1, %v346_v42  ;;  %300 = vst.msk [vmem:[%s540_s3 + $0x2c] sm:$0xf] %vm288_vm1, %v354_v43  ;;  %v194_v51 = vadd.f32 %v455_v9, %v193_v45  ;;  %v377_v52 = vpop.f32.mrf.mxu0  ;;  %v385_v53 = vpop.f32.mrf.mxu1 }
  0xd3   :  { %290 = vst.msk [vmem:[%s540_s3 + $0x4] sm:$0xf] %vm288_vm1, %v344_v46  ;;  %v349_v54 = vpack.c.bf16 %v214_v48, %v214_v48  ;;  %v357_v55 = vpack.c.bf16 %v222_v49, %v222_v49  ;;  %v173_v56 = vadd.f32 %v377_v52, %v455_v9  ;;  %v205_v57 = vadd.f32 %v385_v53, %v455_v9 }
  0xd4   :  { %298 = vst.msk [vmem:[%s540_s3 + $0x24] sm:$0xf] %vm288_vm1, %v352_v47  ;;  %v212_v58 = vmax.f32 %v162_v50, 0.0  ;;  %v220_v59 = vmax.f32 %v194_v51, 0.0  ;;  %v164_v60 = vpop.f32.mrf.mxu0  ;;  %v196_v61 = vpop.f32.mrf.mxu1 }
  0xd5   :  { %295 = vst.msk [vmem:[%s540_s3 + $0x18] sm:$0xf] %vm288_vm1, %v349_v54  ;;  %303 = vst.msk [vmem:[%s540_s3 + $0x38] sm:$0xf] %vm288_vm1, %v357_v55  ;;  %v215_v62 = vmax.f32 %v173_v56, 0.0  ;;  %v223_v63 = vmax.f32 %v205_v57, 0.0  ;;  %v165_v0 = vadd.f32 %v455_v9, %v164_v60  ;;  %v197_v1 = vadd.f32 %v455_v9, %v196_v61 }
  0xd6   :  { %v347_v2 = vpack.c.bf16 %v212_v58, %v212_v58  ;;  %v355_v3 = vpack.c.bf16 %v220_v59, %v220_v59 }
  0xd7   :  { %v350_v4 = vpack.c.bf16 %v215_v62, %v215_v62  ;;  %v358_v5 = vpack.c.bf16 %v223_v63, %v223_v63  ;;  %v213_v6 = vmax.f32 %v165_v0, 0.0  ;;  %v221_v7 = vmax.f32 %v197_v1, 0.0 }
  0xd8   :  { %293 = vst.msk [vmem:[%s540_s3 + $0x10] sm:$0xf] %vm288_vm1, %v347_v2  ;;  %301 = vst.msk [vmem:[%s540_s3 + $0x30] sm:$0xf] %vm288_vm1, %v355_v3 }
  0xd9   :  { %296 = vst.msk [vmem:[%s540_s3 + $0x1c] sm:$0xf] %vm288_vm1, %v350_v4  ;;  %304 = vst.msk [vmem:[%s540_s3 + $0x3c] sm:$0xf] %vm288_vm1, %v358_v5  ;;  %v348_v8 = vpack.c.bf16 %v213_v6, %v213_v6  ;;  %v356_v9 = vpack.c.bf16 %v221_v7, %v221_v7 }
  0xdb   :  { %294 = vst.msk [vmem:[%s540_s3 + $0x14] sm:$0xf] %vm288_vm1, %v348_v8  ;;  %302 = vst.msk [vmem:[%s540_s3 + $0x34] sm:$0xf] %vm288_vm1, %v356_v9 }

</bundles_post_ra>
